<compile_context>
chip_gen: v7x
topology: tpu7x:2x2x1
jax: 0.10.0
libtpu: 0.0.40
codegen_flags: <defaults>
</compile_context>

<pallas_src>
import jax
import jax.numpy as jnp
from jax.experimental import pallas as pl
from jax.experimental.pallas import tpu as pltpu

EPS = 1e-5
HIDDEN_DIMS = (64, 64, 48, 32, 16, 16)
LANE = 128


def _round_up(v, m):
    return -(-v // m) * m


def _mlp_kernel(x_ref,
                w1, b1, w2, b2, w3, b3, w4, b4, w5, b5, w6, b6, w7, b7,
                o_ref):
    """Feature-major body: activations are (feat, TB); batch is the lane axis."""
    x = x_ref[...].astype(jnp.float32)                       # (in_dim, TB)

    # --- InstanceNorm1d (affine=False): per-column (= per-sample) stats over
    #     the feature (sublane) axis.  Two-pass (centered) variance for
    #     numerical stability; the rsqrt is on a lane-dense (1, TB) row.
    inv_n = jnp.float32(1.0 / x.shape[0])
    mean = jnp.sum(x, axis=0, keepdims=True) * inv_n          # (1, TB)
    d = x - mean
    var = jnp.sum(d * d, axis=0, keepdims=True) * inv_n       # (1, TB)
    h = d * jax.lax.rsqrt(var + EPS)                          # (in_dim, TB) f32

    # --- fc1..fc6 with tanh: h_new(out, TB) = W(out, in) @ h(in, TB) + b ---
    # Weights may be bf16 (wrapper-cast); activations are cast at the dot so
    # the MXU runs native bf16 passes while accumulate / bias / tanh stay f32.
    for w_ref, b_ref in ((w1, b1), (w2, b2), (w3, b3),
                         (w4, b4), (w5, b5), (w6, b6)):
        w = w_ref[...]
        z = jnp.dot(w, h.astype(w.dtype), preferred_element_type=jnp.float32)
        h = jnp.tanh(z + b_ref[...])

    # --- fc7 (no activation) ---
    w = w7[...]
    z = jnp.dot(w, h.astype(w.dtype), preferred_element_type=jnp.float32)
    o_ref[...] = (z + b7[...]).astype(o_ref.dtype)


def init_params(key, input_size, output_size):
    """PyTorch-Linear-layout params: weight (out, in), bias (out,),
    U[-1/sqrt(fan_in), +1/sqrt(fan_in)] init (matches nn.Linear default)."""
    dims = [input_size, *HIDDEN_DIMS, output_size]
    params = []
    for i in range(len(dims) - 1):
        fan_in, fan_out = dims[i], dims[i + 1]
        key, kw, kb = jax.random.split(key, 3)
        bound = 1.0 / float(fan_in) ** 0.5
        w = jax.random.uniform(kw, (fan_out, fan_in), jnp.float32, -bound, bound)
        b = jax.random.uniform(kb, (fan_out,), jnp.float32, -bound, bound)
        params.append((w, b))
    return params


def build_network_test_forward(x, params, block_batch=4096,
                               use_bf16_matmul=True):
    batch, in_dim = x.shape
    out_dim = params[-1][0].shape[0]
    itemsize = jnp.dtype(x.dtype).itemsize

    # ---- batch-tile selection (batch lives on the 128-lane axis) ----
    if batch <= LANE:
        tb = batch                                  # single full-extent tile
    else:
        # VMEM guard: double-buffered (in_dim, tb) input tile plus a handful
        # of live (<=64, tb) f32 intermediates must stay well under the
        # 32 MiB scoped-VMEM default -> budget ~24 MiB (generic input_size).
        bytes_per_col = 2 * in_dim * itemsize + 6 * 64 * 4
        tb_vmem = max(LANE, ((24 << 20) // bytes_per_col) // LANE * LANE)
        # At least 2 grid steps so v7x megacore can shard the batch axis.
        tb_split = _round_up(pl.cdiv(batch, 2), LANE)
        tb = max(LANE, (min(block_batch, tb_vmem, tb_split) // LANE) * LANE)

    batch_p = _round_up(batch, tb)
    if batch_p != batch:
        x = jnp.pad(x, ((0, batch_p - batch), (0, 0)))
    # Feature-major (lane-dense) input: (in_dim, batch_p).  Wrapper-side
    # transposes are cheap layout plumbing; the kernel output (out_dim, TB)
    # stores are unmasked, lane-dense vst.
    x_t = x.T
    grid = (batch_p // tb,)

    flat_args = [x_t]
    in_specs = [pl.BlockSpec((in_dim, tb), lambda i: (0, i))]
    for w, b in params:
        if use_bf16_matmul:
            w = w.astype(jnp.bfloat16)   # bf16 MXU operands, f32 accumulate
        flat_args.append(w)
        flat_args.append(b.reshape(-1, 1).astype(jnp.float32))
        # Parameters: same block (0, 0) every grid step -> resident in VMEM.
        in_specs.append(pl.BlockSpec(w.shape, lambda i: (0, 0)))
        in_specs.append(pl.BlockSpec((b.shape[0], 1), lambda i: (0, 0)))

    out_spec = pl.BlockSpec((out_dim, tb), lambda i: (0, i))

    # Advisory cost estimate for XLA scheduling.
    dims = [in_dim, *HIDDEN_DIMS, out_dim]
    flops_per_col = 2 * sum(a * b for a, b in zip(dims[:-1], dims[1:]))
    trans_per_col = sum(dims[1:-1]) + 1            # tanh chain + rsqrt
    weight_bytes = sum(w.size * (2 if use_bf16_matmul else 4) + b.size * 4
                       for w, b in params)
    cost = pl.CostEstimate(
        flops=batch_p * flops_per_col,
        transcendentals=batch_p * trans_per_col,
        bytes_accessed=batch_p * (in_dim * itemsize + out_dim * 4) + weight_bytes,
    )

    out_t = pl.pallas_call(
        _mlp_kernel,
        out_shape=jax.ShapeDtypeStruct((out_dim, batch_p), jnp.float32),
        grid=grid,
        in_specs=in_specs,
        out_specs=out_spec,
        compiler_params=pltpu.CompilerParams(
            dimension_semantics=("parallel",),     # megacore sharding on v7x
        ),
        cost_estimate=cost,
    )(*flat_args)

    return out_t[:, :batch].T


def _reference_forward(x, params):
    """Pure-JAX reference mirroring the PyTorch forward (f32 throughout)."""
    x = x.astype(jnp.float32)
    mean = jnp.mean(x, axis=-1, keepdims=True)
    var = jnp.mean((x - mean) ** 2, axis=-1, keepdims=True)
    h = (x - mean) / jnp.sqrt(var + EPS)
    for i, (w, b) in enumerate(params):
        h = h @ w.T + b
        if i < len(params) - 1:
            h = jnp.tanh(h)
    return h


if __name__ == "__main__":
    input_size = 32
    output_size = 8
    batch = 512          # > 128 so the batch axis is tiled: TB=256, grid=(2,)

    key = jax.random.PRNGKey(0)
    key, kx = jax.random.split(key)
    x = jax.random.normal(kx, (batch, input_size), jnp.float32)
    params = init_params(key, input_size, output_size)

    ref = _reference_forward(x, params)

    # Fast path: bf16 MXU operands, f32 everywhere else.
    out = jax.block_until_ready(build_network_test_forward(x, params))
    assert out.shape == (batch, output_size)
    assert jnp.allclose(out, ref, atol=3e-2, rtol=3e-2), "bf16 path mismatch"

    # Pure-f32 validation path (tight tolerance vs the f32 reference).
    out_f32 = jax.block_until_ready(
        build_network_test_forward(x, params, use_bf16_matmul=False))
    assert out_f32.shape == (batch, output_size)
    assert jnp.allclose(out_f32, ref, atol=3e-4, rtol=3e-4), "f32 path mismatch"

    print("KERNEL_OK")
</pallas_src>

<mosaic_0001>
module attributes {stable_mosaic.version = 11 : i64} {
  func.func @_mlp_kernel(%arg0: i32, %arg1: memref<32x256xf32, #tpu.memory_space<vmem>>, %arg2: memref<64x32xbf16, #tpu.memory_space<vmem>>, %arg3: memref<64x1xf32, #tpu.memory_space<vmem>>, %arg4: memref<64x64xbf16, #tpu.memory_space<vmem>>, %arg5: memref<64x1xf32, #tpu.memory_space<vmem>>, %arg6: memref<48x64xbf16, #tpu.memory_space<vmem>>, %arg7: memref<48x1xf32, #tpu.memory_space<vmem>>, %arg8: memref<32x48xbf16, #tpu.memory_space<vmem>>, %arg9: memref<32x1xf32, #tpu.memory_space<vmem>>, %arg10: memref<16x32xbf16, #tpu.memory_space<vmem>>, %arg11: memref<16x1xf32, #tpu.memory_space<vmem>>, %arg12: memref<16x16xbf16, #tpu.memory_space<vmem>>, %arg13: memref<16x1xf32, #tpu.memory_space<vmem>>, %arg14: memref<8x16xbf16, #tpu.memory_space<vmem>>, %arg15: memref<8x1xf32, #tpu.memory_space<vmem>>, %arg16: memref<8x256xf32, #tpu.memory_space<vmem>>) attributes {dimension_semantics = [#tpu.dimension_semantics<parallel>], iteration_bounds = array<i64: 2>, scalar_prefetch = 0 : i64, scratch_operands = 0 : i64, tpu.core_type = #tpu.core_type<tc>, window_params = [{transform_indices = @transform_0, window_bounds = array<i64: 32, 256>}, {pipeline_mode = #tpu.pipeline_mode<synchronous>, transform_indices = @transform_1, window_bounds = array<i64: 64, 32>}, {pipeline_mode = #tpu.pipeline_mode<synchronous>, transform_indices = @transform_2, window_bounds = array<i64: 64, 1>}, {pipeline_mode = #tpu.pipeline_mode<synchronous>, transform_indices = @transform_3, window_bounds = array<i64: 64, 64>}, {pipeline_mode = #tpu.pipeline_mode<synchronous>, transform_indices = @transform_4, window_bounds = array<i64: 64, 1>}, {pipeline_mode = #tpu.pipeline_mode<synchronous>, transform_indices = @transform_5, window_bounds = array<i64: 48, 64>}, {pipeline_mode = #tpu.pipeline_mode<synchronous>, transform_indices = @transform_6, window_bounds = array<i64: 48, 1>}, {pipeline_mode = #tpu.pipeline_mode<synchronous>, transform_indices = @transform_7, window_bounds = array<i64: 32, 48>}, {pipeline_mode = #tpu.pipeline_mode<synchronous>, transform_indices = @transform_8, window_bounds = array<i64: 32, 1>}, {pipeline_mode = #tpu.pipeline_mode<synchronous>, transform_indices = @transform_9, window_bounds = array<i64: 16, 32>}, {pipeline_mode = #tpu.pipeline_mode<synchronous>, transform_indices = @transform_10, window_bounds = array<i64: 16, 1>}, {pipeline_mode = #tpu.pipeline_mode<synchronous>, transform_indices = @transform_11, window_bounds = array<i64: 16, 16>}, {pipeline_mode = #tpu.pipeline_mode<synchronous>, transform_indices = @transform_12, window_bounds = array<i64: 16, 1>}, {pipeline_mode = #tpu.pipeline_mode<synchronous>, transform_indices = @transform_13, window_bounds = array<i64: 8, 16>}, {pipeline_mode = #tpu.pipeline_mode<synchronous>, transform_indices = @transform_14, window_bounds = array<i64: 8, 1>}, {transform_indices = @transform_15, window_bounds = array<i64: 8, 256>}]} {
    %c0 = arith.constant 0 : index
    %c0_0 = arith.constant 0 : index
    %0 = vector.load %arg1[%c0, %c0_0] : memref<32x256xf32, #tpu.memory_space<vmem>>, vector<32x256xf32>
    %cst = arith.constant dense<0.000000e+00> : vector<256xf32>
    %1 = vector.multi_reduction <add>, %0, %cst [0] : vector<32x256xf32> to vector<256xf32>
    %2 = vector.shape_cast %1 : vector<256xf32> to vector<1x256xf32>
    %cst_1 = arith.constant 3.125000e-02 : f32
    %3 = vector.broadcast %cst_1 : f32 to vector<1x256xf32>
    %4 = arith.mulf %2, %3 : vector<1x256xf32>
    %5 = vector.broadcast %4 : vector<1x256xf32> to vector<32x256xf32>
    %6 = arith.subf %0, %5 : vector<32x256xf32>
    %7 = arith.mulf %6, %6 : vector<32x256xf32>
    %cst_2 = arith.constant dense<0.000000e+00> : vector<256xf32>
    %8 = vector.multi_reduction <add>, %7, %cst_2 [0] : vector<32x256xf32> to vector<256xf32>
    %9 = vector.shape_cast %8 : vector<256xf32> to vector<1x256xf32>
    %cst_3 = arith.constant 3.125000e-02 : f32
    %10 = vector.broadcast %cst_3 : f32 to vector<1x256xf32>
    %11 = arith.mulf %9, %10 : vector<1x256xf32>
    %cst_4 = arith.constant 9.99999974E-6 : f32
    %12 = vector.broadcast %cst_4 : f32 to vector<1x256xf32>
    %13 = arith.addf %11, %12 : vector<1x256xf32>
    %14 = math.rsqrt %13 : vector<1x256xf32>
    %15 = vector.broadcast %14 : vector<1x256xf32> to vector<32x256xf32>
    %16 = arith.mulf %6, %15 : vector<32x256xf32>
    %c0_5 = arith.constant 0 : index
    %c0_6 = arith.constant 0 : index
    %17 = vector.load %arg2[%c0_5, %c0_6] : memref<64x32xbf16, #tpu.memory_space<vmem>>, vector<64x32xbf16>
    %18 = arith.truncf %16 : vector<32x256xf32> to vector<32x256xbf16>
    %cst_7 = arith.constant dense<0.000000e+00> : vector<64x256xf32>
    %19 = tpu.matmul %17, %18, %cst_7 {dimension_numbers = #tpu.dot_dimension_numbers<[1], [0], [0], [1], [0, 0, 1, 1], [], []>} : vector<64x32xbf16>, vector<32x256xbf16>, vector<64x256xf32> -> vector<64x256xf32>
    %c0_8 = arith.constant 0 : index
    %c0_9 = arith.constant 0 : index
    %20 = vector.load %arg3[%c0_8, %c0_9] : memref<64x1xf32, #tpu.memory_space<vmem>>, vector<64x1xf32>
    %21 = vector.broadcast %20 : vector<64x1xf32> to vector<64x256xf32>
    %22 = arith.addf %19, %21 : vector<64x256xf32>
    %23 = math.tanh %22 : vector<64x256xf32>
    %c0_10 = arith.constant 0 : index
    %c0_11 = arith.constant 0 : index
    %24 = vector.load %arg4[%c0_10, %c0_11] : memref<64x64xbf16, #tpu.memory_space<vmem>>, vector<64x64xbf16>
    %25 = arith.truncf %23 : vector<64x256xf32> to vector<64x256xbf16>
    %cst_12 = arith.constant dense<0.000000e+00> : vector<64x256xf32>
    %26 = tpu.matmul %24, %25, %cst_12 {dimension_numbers = #tpu.dot_dimension_numbers<[1], [0], [0], [1], [0, 0, 1, 1], [], []>} : vector<64x64xbf16>, vector<64x256xbf16>, vector<64x256xf32> -> vector<64x256xf32>
    %c0_13 = arith.constant 0 : index
    %c0_14 = arith.constant 0 : index
    %27 = vector.load %arg5[%c0_13, %c0_14] : memref<64x1xf32, #tpu.memory_space<vmem>>, vector<64x1xf32>
    %28 = vector.broadcast %27 : vector<64x1xf32> to vector<64x256xf32>
    %29 = arith.addf %26, %28 : vector<64x256xf32>
    %30 = math.tanh %29 : vector<64x256xf32>
    %c0_15 = arith.constant 0 : index
    %c0_16 = arith.constant 0 : index
    %31 = vector.load %arg6[%c0_15, %c0_16] : memref<48x64xbf16, #tpu.memory_space<vmem>>, vector<48x64xbf16>
    %32 = arith.truncf %30 : vector<64x256xf32> to vector<64x256xbf16>
    %cst_17 = arith.constant dense<0.000000e+00> : vector<48x256xf32>
    %33 = tpu.matmul %31, %32, %cst_17 {dimension_numbers = #tpu.dot_dimension_numbers<[1], [0], [0], [1], [0, 0, 1, 1], [], []>} : vector<48x64xbf16>, vector<64x256xbf16>, vector<48x256xf32> -> vector<48x256xf32>
    %c0_18 = arith.constant 0 : index
    %c0_19 = arith.constant 0 : index
    %34 = vector.load %arg7[%c0_18, %c0_19] : memref<48x1xf32, #tpu.memory_space<vmem>>, vector<48x1xf32>
    %35 = vector.broadcast %34 : vector<48x1xf32> to vector<48x256xf32>
    %36 = arith.addf %33, %35 : vector<48x256xf32>
    %37 = math.tanh %36 : vector<48x256xf32>
    %c0_20 = arith.constant 0 : index
    %c0_21 = arith.constant 0 : index
    %38 = vector.load %arg8[%c0_20, %c0_21] : memref<32x48xbf16, #tpu.memory_space<vmem>>, vector<32x48xbf16>
    %39 = arith.truncf %37 : vector<48x256xf32> to vector<48x256xbf16>
    %cst_22 = arith.constant dense<0.000000e+00> : vector<32x256xf32>
    %40 = tpu.matmul %38, %39, %cst_22 {dimension_numbers = #tpu.dot_dimension_numbers<[1], [0], [0], [1], [0, 0, 1, 1], [], []>} : vector<32x48xbf16>, vector<48x256xbf16>, vector<32x256xf32> -> vector<32x256xf32>
    %c0_23 = arith.constant 0 : index
    %c0_24 = arith.constant 0 : index
    %41 = vector.load %arg9[%c0_23, %c0_24] : memref<32x1xf32, #tpu.memory_space<vmem>>, vector<32x1xf32>
    %42 = vector.broadcast %41 : vector<32x1xf32> to vector<32x256xf32>
    %43 = arith.addf %40, %42 : vector<32x256xf32>
    %44 = math.tanh %43 : vector<32x256xf32>
    %c0_25 = arith.constant 0 : index
    %c0_26 = arith.constant 0 : index
    %45 = vector.load %arg10[%c0_25, %c0_26] : memref<16x32xbf16, #tpu.memory_space<vmem>>, vector<16x32xbf16>
    %46 = arith.truncf %44 : vector<32x256xf32> to vector<32x256xbf16>
    %cst_27 = arith.constant dense<0.000000e+00> : vector<16x256xf32>
    %47 = tpu.matmul %45, %46, %cst_27 {dimension_numbers = #tpu.dot_dimension_numbers<[1], [0], [0], [1], [0, 0, 1, 1], [], []>} : vector<16x32xbf16>, vector<32x256xbf16>, vector<16x256xf32> -> vector<16x256xf32>
    %c0_28 = arith.constant 0 : index
    %c0_29 = arith.constant 0 : index
    %48 = vector.load %arg11[%c0_28, %c0_29] : memref<16x1xf32, #tpu.memory_space<vmem>>, vector<16x1xf32>
    %49 = vector.broadcast %48 : vector<16x1xf32> to vector<16x256xf32>
    %50 = arith.addf %47, %49 : vector<16x256xf32>
    %51 = math.tanh %50 : vector<16x256xf32>
    %c0_30 = arith.constant 0 : index
    %c0_31 = arith.constant 0 : index
    %52 = vector.load %arg12[%c0_30, %c0_31] : memref<16x16xbf16, #tpu.memory_space<vmem>>, vector<16x16xbf16>
    %53 = arith.truncf %51 : vector<16x256xf32> to vector<16x256xbf16>
    %cst_32 = arith.constant dense<0.000000e+00> : vector<16x256xf32>
    %54 = tpu.matmul %52, %53, %cst_32 {dimension_numbers = #tpu.dot_dimension_numbers<[1], [0], [0], [1], [0, 0, 1, 1], [], []>} : vector<16x16xbf16>, vector<16x256xbf16>, vector<16x256xf32> -> vector<16x256xf32>
    %c0_33 = arith.constant 0 : index
    %c0_34 = arith.constant 0 : index
    %55 = vector.load %arg13[%c0_33, %c0_34] : memref<16x1xf32, #tpu.memory_space<vmem>>, vector<16x1xf32>
    %56 = vector.broadcast %55 : vector<16x1xf32> to vector<16x256xf32>
    %57 = arith.addf %54, %56 : vector<16x256xf32>
    %58 = math.tanh %57 : vector<16x256xf32>
    %c0_35 = arith.constant 0 : index
    %c0_36 = arith.constant 0 : index
    %59 = vector.load %arg14[%c0_35, %c0_36] : memref<8x16xbf16, #tpu.memory_space<vmem>>, vector<8x16xbf16>
    %60 = arith.truncf %58 : vector<16x256xf32> to vector<16x256xbf16>
    %cst_37 = arith.constant dense<0.000000e+00> : vector<8x256xf32>
    %61 = tpu.matmul %59, %60, %cst_37 {dimension_numbers = #tpu.dot_dimension_numbers<[1], [0], [0], [1], [0, 0, 1, 1], [], []>} : vector<8x16xbf16>, vector<16x256xbf16>, vector<8x256xf32> -> vector<8x256xf32>
    %c0_38 = arith.constant 0 : index
    %c0_39 = arith.constant 0 : index
    %62 = vector.load %arg15[%c0_38, %c0_39] : memref<8x1xf32, #tpu.memory_space<vmem>>, vector<8x1xf32>
    %63 = vector.broadcast %62 : vector<8x1xf32> to vector<8x256xf32>
    %64 = arith.addf %61, %63 : vector<8x256xf32>
    %c0_40 = arith.constant 0 : index
    %c0_41 = arith.constant 0 : index
    %65 = vector.load %arg16[%c0_40, %c0_41] : memref<8x256xf32, #tpu.memory_space<vmem>>, vector<8x256xf32>
    tpu.vector_store %arg16[%c0_40, %c0_41], %64 {strides = array<i32>} : memref<8x256xf32, #tpu.memory_space<vmem>>, vector<8x256xf32>,
    return
  }
  func.func @transform_0(%arg0: i32) -> (i32, i32) {
    %c0_i32 = arith.constant 0 : i32
    %c0_i32_0 = arith.constant 0 : i32
    return %c0_i32, %arg0 : i32, i32
  }
  func.func @transform_1(%arg0: i32) -> (i32, i32) {
    %c0_i32 = arith.constant 0 : i32
    %c0_i32_0 = arith.constant 0 : i32
    %c0_i32_1 = arith.constant 0 : i32
    return %c0_i32, %c0_i32_0 : i32, i32
  }
  func.func @transform_2(%arg0: i32) -> (i32, i32) {
    %c0_i32 = arith.constant 0 : i32
    %c0_i32_0 = arith.constant 0 : i32
    %c0_i32_1 = arith.constant 0 : i32
    return %c0_i32, %c0_i32_0 : i32, i32
  }
  func.func @transform_3(%arg0: i32) -> (i32, i32) {
    %c0_i32 = arith.constant 0 : i32
    %c0_i32_0 = arith.constant 0 : i32
    %c0_i32_1 = arith.constant 0 : i32
    return %c0_i32, %c0_i32_0 : i32, i32
  }
  func.func @transform_4(%arg0: i32) -> (i32, i32) {
    %c0_i32 = arith.constant 0 : i32
    %c0_i32_0 = arith.constant 0 : i32
    %c0_i32_1 = arith.constant 0 : i32
    return %c0_i32, %c0_i32_0 : i32, i32
  }
  func.func @transform_5(%arg0: i32) -> (i32, i32) {
    %c0_i32 = arith.constant 0 : i32
    %c0_i32_0 = arith.constant 0 : i32
    %c0_i32_1 = arith.constant 0 : i32
    return %c0_i32, %c0_i32_0 : i32, i32
  }
  func.func @transform_6(%arg0: i32) -> (i32, i32) {
    %c0_i32 = arith.constant 0 : i32
    %c0_i32_0 = arith.constant 0 : i32
    %c0_i32_1 = arith.constant 0 : i32
    return %c0_i32, %c0_i32_0 : i32, i32
  }
  func.func @transform_7(%arg0: i32) -> (i32, i32) {
    %c0_i32 = arith.constant 0 : i32
    %c0_i32_0 = arith.constant 0 : i32
    %c0_i32_1 = arith.constant 0 : i32
    return %c0_i32, %c0_i32_0 : i32, i32
  }
  func.func @transform_8(%arg0: i32) -> (i32, i32) {
    %c0_i32 = arith.constant 0 : i32
    %c0_i32_0 = arith.constant 0 : i32
    %c0_i32_1 = arith.constant 0 : i32
    return %c0_i32, %c0_i32_0 : i32, i32
  }
  func.func @transform_9(%arg0: i32) -> (i32, i32) {
    %c0_i32 = arith.constant 0 : i32
    %c0_i32_0 = arith.constant 0 : i32
    %c0_i32_1 = arith.constant 0 : i32
    return %c0_i32, %c0_i32_0 : i32, i32
  }
  func.func @transform_10(%arg0: i32) -> (i32, i32) {
    %c0_i32 = arith.constant 0 : i32
    %c0_i32_0 = arith.constant 0 : i32
    %c0_i32_1 = arith.constant 0 : i32
    return %c0_i32, %c0_i32_0 : i32, i32
  }
  func.func @transform_11(%arg0: i32) -> (i32, i32) {
    %c0_i32 = arith.constant 0 : i32
    %c0_i32_0 = arith.constant 0 : i32
    %c0_i32_1 = arith.constant 0 : i32
    return %c0_i32, %c0_i32_0 : i32, i32
  }
  func.func @transform_12(%arg0: i32) -> (i32, i32) {
    %c0_i32 = arith.constant 0 : i32
    %c0_i32_0 = arith.constant 0 : i32
    %c0_i32_1 = arith.constant 0 : i32
    return %c0_i32, %c0_i32_0 : i32, i32
  }
  func.func @transform_13(%arg0: i32) -> (i32, i32) {
    %c0_i32 = arith.constant 0 : i32
    %c0_i32_0 = arith.constant 0 : i32
    %c0_i32_1 = arith.constant 0 : i32
    return %c0_i32, %c0_i32_0 : i32, i32
  }
  func.func @transform_14(%arg0: i32) -> (i32, i32) {
    %c0_i32 = arith.constant 0 : i32
    %c0_i32_0 = arith.constant 0 : i32
    %c0_i32_1 = arith.constant 0 : i32
    return %c0_i32, %c0_i32_0 : i32, i32
  }
  func.func @transform_15(%arg0: i32) -> (i32, i32) {
    %c0_i32 = arith.constant 0 : i32
    %c0_i32_0 = arith.constant 0 : i32
    return %c0_i32, %arg0 : i32, i32
  }
}

</mosaic_0001>

<bundles_post_ra>
// kernel: tpu_custom_call.1
= control target key start
LH: loop header
LB: loop body
LE: loop exit
PB: predicated region body
PF: predicated region fallthrough
CT: control target
= control target key end

     0   :  { %s2212_s0 = inlined_call_operand.vmem [shape: f32[32,512], index: 0, kind: input, shape index: {}]   ;;  %s2213_s1 = inlined_call_operand.vmem [shape: bf16[64,32], index: 1, kind: input, shape index: {}]   ;;  %s2214_s2 = inlined_call_operand.vmem [shape: f32[64,1], index: 2, kind: input, shape index: {}]   ;;  %s2215_s3 = inlined_call_operand.vmem [shape: bf16[64,64], index: 3, kind: input, shape index: {}]   ;;  %s2216_s4 = inlined_call_operand.vmem [shape: f32[64,1], index: 4, kind: input, shape index: {}]   ;;  %s2217_s5 = inlined_call_operand.vmem [shape: bf16[48,64], index: 5, kind: input, shape index: {}]   ;;  %s2218_s6 = inlined_call_operand.vmem [shape: f32[48,1], index: 6, kind: input, shape index: {}]   ;;  %s2219_s7 = inlined_call_operand.vmem [shape: bf16[32,48], index: 7, kind: input, shape index: {}]   ;;  %s2220_s8 = inlined_call_operand.vmem [shape: f32[32,1], index: 8, kind: input, shape index: {}]   ;;  %s2221_s9 = inlined_call_operand.vmem [shape: bf16[16,32], index: 9, kind: input, shape index: {}]   ;;  %s2222_s10 = inlined_call_operand.vmem [shape: f32[16,1], index: 10, kind: input, shape index: {}]   ;;  %s2223_s11 = inlined_call_operand.vmem [shape: bf16[16,16], index: 11, kind: input, shape index: {}]   ;;  %s2224_s12 = inlined_call_operand.vmem [shape: f32[16,1], index: 12, kind: input, shape index: {}]   ;;  %s2225_s13 = inlined_call_operand.vmem [shape: bf16[8,16], index: 13, kind: input, shape index: {}]   ;;  %s2226_s14 = inlined_call_operand.vmem [shape: f32[8,1], index: 14, kind: input, shape index: {}]   ;;  %s2227_s15 = inlined_call_operand.hbm [shape: f32[8,512], index: 15, kind: output, shape index: {}]  }
   0x1   :  { %2230 = sst [smem:[#allocation8_spill]] %s2212_s0 }
   0x2   :  { %2231 = sst [smem:[#allocation9_spill]] %s2213_s1 }
   0x3   :  { %20 = vsyncpa [#allocation4], 0 }
   0x4   :  { %22 = vsyncpa [#allocation4 + $0x1], 0  ;;  %s1889_s18 = smov 0   ;;  %s1891_s19 = smov 0  }
   0x5   :  { %s1893_s20 = smov 0   ;;  %s1895_s21 = smov 0  }
   0x6 LB: > { %2232 = sst [smem:[#allocation6_spill]] %s1801_s20  ;;  %s2228_s22 = sadd.s32 4294967295, %s1805_s21   ;;  %s1805_s21 = sphi %s1895_s21, %s2243_s21   ;;  %s1801_s20 = sphi %s1893_s20, %s2240_s20   ;;  %s1797_s19 = sphi %s1891_s19, %s2242_s19   ;;  %s1793_s18 = sphi %s1889_s18, %s2241_s18  }
   0x7   : > { %s1515_s23 = sadd.s32 4294967294, %s1805_s21   ;;  %s1912_s24 = sadd.s32 1, %s1805_s21  }
   0x8   : > { %s35_s25 = sadd.s32 1, %s1801_s20  ;;  %s32_s26 = ssub.s32 %s1805_s21, %s1912_s24 }
   0x9   : > { %p42_p0 = scmp.ne.s32.totalorder %s1801_s20, %s1797_s19  ;;  %p33_p1 = scmp.eq.s32.totalorder %s32_s26, 0 }
   0xa   : > { %p43_p2 = scmp.eq.s32.totalorder %s1805_s21, 0  ;;  %p366_p3 = scmp.eq.s32.totalorder %s2228_s22, 1 }
   0xb   : > { %p371_p4 = scmp.ne.s32.totalorder %s1797_s19, %s1793_s18  ;;  %p372_p7 = scmp.eq.s32.totalorder %s1515_s23, 1 }
   0xc   : > { %s1925_s27 = scalar_select %p33_p1, %s1801_s20, %s35_s25  }
   0xd   : > { %p44_p5 = por %p43_p2, %p42_p0  ;;  %p1927_p6 = por %p366_p3, %p42_p0 }
   0xe   : > { %2233 = sst [smem:[#allocation7_spill]] %s1925_s27  ;;  %p1931_p8 = por %p372_p7, %p371_p4 }
   0xf   : > { %p1517_p9 = scmp.ge.s32.totalorder %s1805_s21, 2 }
  0x11   : > { %430 = sbr.rel (%p1517_p9) target bundleno = 38 (0x26), region = 72 }
  0x18   : > { %433 = sbr.rel (!%p44_p5) target bundleno = 38 (0x26), region = 76  ;;  %s435_s30 = sand.u32 (%p44_p5), 1, %s1801_s20  }
  0x19   : > { %s1560_s16 = sshll.u32 (%p44_p5), %s1805_s21, 4  ;;  %s1518_s17 = sshll.u32 (%p44_p5), %s435_s30, 6 }
  0x1a   : > { %s2236_s0 = sld [smem:[#allocation8_spill]] (%p44_p5)  ;;  %s437_s23 = scalar_lea.vmem (%p44_p5), [#allocation2], %s1518_s17 }
  0x20   : > { %s440_s22 = scalar_lea.vmem %s2236_s0, %s1560_s16 }
  0x21   : > { %v453_v0 = vld [vmem:[%s440_s22] sm:$0xff]  ;;  %v455_v1 = vld [vmem:[%s440_s22 + $0x8] sm:$0xff] }
  0x22   : > { %v457_v2 = vld [vmem:[%s440_s22 + $0x20] sm:$0xff]  ;;  %454 = vst [vmem:[%s437_s23] sm:$0xff] %v453_v0  ;;  %456 = vst [vmem:[%s437_s23 + $0x8] sm:$0xff] %v455_v1  ;;  %v459_v3 = vld [vmem:[%s440_s22 + $0x28] sm:$0xff] }
  0x23   : > { %458 = vst [vmem:[%s437_s23 + $0x10] sm:$0xff] %v457_v2  ;;  %v461_v4 = vld [vmem:[%s440_s22 + $0x40] sm:$0xff]  ;;  %v463_v5 = vld [vmem:[%s440_s22 + $0x48] sm:$0xff]  ;;  %460 = vst [vmem:[%s437_s23 + $0x18] sm:$0xff] %v459_v3 }
  0x24   : > { %462 = vst [vmem:[%s437_s23 + $0x20] sm:$0xff] %v461_v4  ;;  %464 = vst [vmem:[%s437_s23 + $0x28] sm:$0xff] %v463_v5  ;;  %v465_v6 = vld [vmem:[%s440_s22 + $0x60] sm:$0xff]  ;;  %v467_v7 = vld [vmem:[%s440_s22 + $0x68] sm:$0xff] }
  0x25   : > { %466 = vst [vmem:[%s437_s23 + $0x30] sm:$0xff] %v465_v6  ;;  %468 = vst [vmem:[%s437_s23 + $0x38] sm:$0xff] %v467_v7 }
  0x26 PF: > { %p1521_p10 = scmp.ge.s32.totalorder %s1805_s21, 1  ;;  %p473_p11 = scmp.lt.s32.totalorder %s1805_s21, 3 }
  0x28   : > { %p474_p12 = pnand %p1521_p10, %p473_p11 }
  0x29   : > { %s1946_s30 = sand.u32 (!%p474_p12), 1, %s1797_s19   ;;  %v1807_v8 = vmov (!%p474_p12), 0   ;;  %v618_v21 = vld [vmem:[%s2214_s2] sm:$0xff] (!%p474_p12)  ;;  %v620_v22 = vld [vmem:[%s2214_s2 + $0x10] sm:$0xff] (!%p474_p12)  ;;  %v619_v25 = vld [vmem:[%s2214_s2 + $0x8] sm:$0xff] (!%p474_p12)  ;;  %s2237_s1 = sld [smem:[#allocation9_spill]] (!%p474_p12) }
  0x2a   : > { %477 = sbr.rel (%p474_p12) target bundleno = 1819 (0x71b), region = 99  ;;  %s1522_s16 = sshll.u32 (!%p474_p12), %s1946_s30, 6  ;;  %731 = vmatprep.mubr.bf16.mxu0 (!%p474_p12), %v1807_v8  ;;  %1602 = vset.pattern.permute.xlu0 (!%p474_p12), %v1807_v8  ;;  %v621_v26 = vld [vmem:[%s2214_s2 + $0x18] sm:$0xff] (!%p474_p12)  ;;  %v622_v31 = vld [vmem:[%s2214_s2 + $0x20] sm:$0xff] (!%p474_p12)  ;;  %v623_v32 = vld [vmem:[%s2214_s2 + $0x28] sm:$0xff] (!%p474_p12)  ;;  %vm686_vm0 = vcmask (!%p474_p12), 261120  }
  0x2b   : > { %1603 = vset.pattern.permute.xlu1 (!%p474_p12), %v1807_v8  ;;  %917 = vmatprep.mubr.bf16.mxu1 (!%p474_p12), %v1807_v8  ;;  %s482_s22 = scalar_lea.vmem (!%p474_p12), [#allocation2], %s1522_s16  ;;  %v624_v36 = vld [vmem:[%s2214_s2 + $0x30] sm:$0xff] (!%p474_p12)  ;;  %v625_v38 = vld [vmem:[%s2214_s2 + $0x38] sm:$0xff] (!%p474_p12)  ;;  %v804_v41 = vld [vmem:[%s2216_s4] sm:$0xff] (!%p474_p12)  ;;  %vm872_vm1 = vcmask (!%p474_p12), 523264   ;;  %vm1167_vm2 = vcmask (!%p474_p12), 392192  }
  0x2c   : > { %v531_v9 = vld [vmem:[%s482_s22 + $0x8] sm:$0xff] (!%p474_p12)  ;;  %v533_v10 = vld [vmem:[%s482_s22 + $0x18] sm:$0xff] (!%p474_p12)  ;;  %v530_v13 = vld [vmem:[%s482_s22] sm:$0xff] (!%p474_p12)  ;;  %628 = vperm.xlu0 (!%p474_p12), %1602, %v618_v21   ;;  %638 = vperm.xlu1 (!%p474_p12), %1603, %v620_v22   ;;  %vm1329_vm3 = vcmask (!%p474_p12), 130048   ;;  %s1523_s20 = sshll.u32 (!%p474_p12), %s1946_s30, 4  ;;  %s2238_s27 = sadd.s32 (!%p474_p12), 4294967295, %s1805_s21  }
  0x2d   : > { %v535_v11 = vld [vmem:[%s482_s22 + $0x28] sm:$0xff] (!%p474_p12)  ;;  %v547_v12 = vadd.f32 (!%p474_p12), %v533_v10, %v531_v9  ;;  %v532_v14 = vld [vmem:[%s482_s22 + $0x10] sm:$0xff] (!%p474_p12)  ;;  %v537_v15 = vld [vmem:[%s482_s22 + $0x38] sm:$0xff] (!%p474_p12)  ;;  %s1561_s23 = sshll.u32 (!%p474_p12), %s2238_s27, 8  ;;  %s526_s16 = scalar_lea.vmem (!%p474_p12), [#allocation3], %s1523_s20 }
  0x2e   : > { %v534_v16 = vld [vmem:[%s482_s22 + $0x20] sm:$0xff] (!%p474_p12)  ;;  %v538_v17 = vadd.f32 (!%p474_p12), %v532_v14, %v530_v13  ;;  %v536_v19 = vld [vmem:[%s482_s22 + $0x30] sm:$0xff] (!%p474_p12)  ;;  %v805_v45 = vld [vmem:[%s2216_s4 + $0x8] sm:$0xff] (!%p474_p12)  ;;  %s1450_s22 = sshll.u32 (!%p474_p12), %s526_s16, 4  ;;  %s2168_s26 = scalar_lea.hbm (!%p474_p12), %s2227_s15, %s1561_s23  ;;  %s2170_s22 = int_to_ptr.vmem [resolvable:$true] %s1450_s22 }
  0x2f   : > { %v548_v18 = vadd.f32 (!%p474_p12), %v547_v12, %v535_v11  ;;  %v806_v47 = vld [vmem:[%s2216_s4 + $0x10] sm:$0xff] (!%p474_p12)  ;;  %v807_v59 = vld [vmem:[%s2216_s4 + $0x18] sm:$0xff] (!%p474_p12)  ;;  %v808_v3 = vld [vmem:[%s2216_s4 + $0x20] sm:$0xff] (!%p474_p12)  ;;  %s1436_s0 = scalar_lea.sflag (!%p474_p12), [#allocation4], %s1946_s30  ;;  %s1743_s20 = scalar_lea.vmem (!%p474_p12), %s2170_s22, 256 }
  0x30   : > { %v539_v20 = vadd.f32 (!%p474_p12), %v538_v17, %v534_v16  ;;  %633 = vperm.xlu0 (!%p474_p12), %1602, %v619_v25   ;;  %643 = vperm.xlu1 (!%p474_p12), %1603, %v621_v26   ;;  %v809_v5 = vld [vmem:[%s2216_s4 + $0x28] sm:$0xff] (!%p474_p12)  ;;  %v811_v12 = vld [vmem:[%s2216_s4 + $0x38] sm:$0xff] (!%p474_p12)  ;;  %v990_v22 = vld [vmem:[%s2218_s6 + $0x10] sm:$0xff] (!%p474_p12)  ;;  %p1744_p13 = scmp.ne.s32.totalorder (!%p474_p12), %s2170_s22, %s1743_s20  ;;  %s1808_s27 = smov (!%p474_p12), [#allocation3]  }
  0x31   : > { %v549_v23 = vadd.f32 %v548_v18, %v537_v15  ;;  %v989_v18 = vld [vmem:[%s2218_s6 + $0x8] sm:$0xff] }
  0x32   : > { %v540_v24 = vadd.f32 %v539_v20, %v536_v19  ;;  %p1745_p0 = pnand %p1744_p13, %p1927_p6 }
  0x33   : > { %v550_v27 = vrot.slane %v549_v23, 4 }
  0x34   : > { %v541_v28 = vrot.slane %v540_v24, 4  ;;  %648 = vperm.xlu0 %1602, %v622_v31   ;;  %653 = vperm.xlu1 %1603, %v623_v32   ;;  %p1746_p1 = pneg %p1745_p0 }
  0x35   : > { %v551_v29 = vadd.f32 %v550_v27, %v549_v23 }
  0x36   : > { %v542_v30 = vadd.f32 %v541_v28, %v540_v24  ;;  %v991_v24 = vld [vmem:[%s2218_s6 + $0x18] sm:$0xff]  ;;  %v992_v28 = vld [vmem:[%s2218_s6 + $0x20] sm:$0xff] }
  0x37   : > { %v552_v33 = vrot.slane %v551_v29, 2 }
  0x38   : > { %v543_v34 = vrot.slane %v542_v30, 2  ;;  %658 = vperm.xlu0 %1602, %v624_v36   ;;  %663 = vperm.xlu1 %1603, %v625_v38   ;;  %v1135_v36 = vld [vmem:[%s2220_s8 + $0x10] sm:$0xff]  ;;  %v1241_v38 = vld [vmem:[%s2222_s10] sm:$0xff] }
  0x39   : > { %v553_v35 = vadd.f32 %v552_v33, %v551_v29 }
  0x3a   : > { %v544_v37 = vadd.f32 %v543_v34, %v542_v30  ;;  %v993_v30 = vld [vmem:[%s2218_s6 + $0x28] sm:$0xff]  ;;  %v1133_v34 = vld [vmem:[%s2220_s8] sm:$0xff] }
  0x3b   : > { %v554_v39 = vrot.slane %v553_v35, 1 }
  0x3c   : > { %v545_v40 = vrot.slane %v544_v37, 1  ;;  %814 = vperm.xlu0 %1602, %v804_v41   ;;  %819 = vperm.xlu1 %1603, %v805_v45  }
  0x3d   : > { %v555_v42 = vadd.f32 %v554_v39, %v553_v35  ;;  %v1134_v35 = vld [vmem:[%s2220_s8 + $0x8] sm:$0xff] }
  0x3e   : > { %v546_v43 = vadd.f32 %v545_v40, %v544_v37  ;;  %v1136_v37 = vld [vmem:[%s2220_s8 + $0x18] sm:$0xff]  ;;  %v1242_v39 = vld [vmem:[%s2222_s10 + $0x8] sm:$0xff] }
  0x3f   : > { %v557_v44 = vmul.f32 0.03125, %v555_v42 }
  0x40   : > { %v556_v46 = vmul.f32 0.03125, %v546_v43  ;;  %824 = vperm.xlu0 %1602, %v806_v47   ;;  %829 = vperm.xlu1 %1603, %v807_v59   ;;  %v1383_v59 = vld [vmem:[%s2226_s14] sm:$0xff] }
  0x41   : > { %v1986_v48 = vsub.f32 %v531_v9, %v557_v44  ;;  %v1988_v49 = vsub.f32 %v533_v10, %v557_v44  ;;  %v1990_v50 = vsub.f32 %v535_v11, %v557_v44  ;;  %v1992_v51 = vsub.f32 %v537_v15, %v557_v44  ;;  %v810_v10 = vld [vmem:[%s2216_s4 + $0x30] sm:$0xff] }
  0x42   : > { %v1994_v52 = vsub.f32 %v530_v13, %v556_v46  ;;  %v1996_v53 = vsub.f32 %v532_v14, %v556_v46  ;;  %v1998_v54 = vsub.f32 %v534_v16, %v556_v46  ;;  %v2000_v55 = vsub.f32 %v536_v19, %v556_v46  ;;  %v988_v16 = vld [vmem:[%s2218_s6] sm:$0xff] }
  0x43   : > { %v567_v56 = vmul.f32 %v1986_v48, %v1986_v48  ;;  %v569_v57 = vmul.f32 %v1988_v49, %v1988_v49  ;;  %v571_v58 = vmul.f32 %v1990_v50, %v1990_v50  ;;  %v573_v63 = vmul.f32 %v1992_v51, %v1992_v51  ;;  %v1312_v46 = vld [vmem:[%s2224_s12] sm:$0xff] }
  0x44   : > { %v566_v60 = vmul.f32 %v1994_v52, %v1994_v52  ;;  %v568_v61 = vmul.f32 %v1996_v53, %v1996_v53  ;;  %v570_v62 = vmul.f32 %v1998_v54, %v1998_v54  ;;  %v572_v1 = vmul.f32 %v2000_v55, %v2000_v55  ;;  %834 = vperm.xlu0 %1602, %v808_v3  }
  0x45   : > { %v583_v0 = vadd.f32 %v569_v57, %v567_v56  ;;  %839 = vperm.xlu1 %1603, %v809_v5  }
  0x46   : > { %v574_v2 = vadd.f32 %v568_v61, %v566_v60  ;;  %v1607_v60 = vld [vmem:[%s2237_s1 + $0x18] sm:$0xff]  }
  0x47   : > { %v584_v4 = vadd.f32 %v583_v0, %v571_v58 }
  0x48   : > { %v575_v6 = vadd.f32 %v574_v2, %v570_v62  ;;  %844 = vperm.xlu0 %1602, %v810_v10  }
  0x49   : > { %v585_v7 = vadd.f32 %v584_v4, %v573_v63  ;;  %849 = vperm.xlu1 %1603, %v811_v12  }
  0x4a   : > { %v576_v9 = vadd.f32 %v575_v6, %v572_v1 }
  0x4b   : > { %v586_v11 = vrot.slane %v585_v7, 4 }
  0x4c   : > { %v577_v13 = vrot.slane %v576_v9, 4  ;;  %996 = vperm.xlu0 %1602, %v988_v16  }
  0x4d   : > { %v587_v14 = vadd.f32 %v586_v11, %v585_v7  ;;  %1001 = vperm.xlu1 %1603, %v989_v18  }
  0x4e   : > { %v578_v15 = vadd.f32 %v577_v13, %v576_v9 }
  0x4f   : > { %v588_v17 = vrot.slane %v587_v14, 2 }
  0x50   : > { %v579_v19 = vrot.slane %v578_v15, 2  ;;  %1006 = vperm.xlu0 %1602, %v990_v22  }
  0x51   : > { %v589_v20 = vadd.f32 %v588_v17, %v587_v14  ;;  %1011 = vperm.xlu1 %1603, %v991_v24  }
  0x52   : > { %v580_v21 = vadd.f32 %v579_v19, %v578_v15 }
  0x53   : > { %v590_v23 = vrot.slane %v589_v20, 1 }
  0x54   : > { %v581_v25 = vrot.slane %v580_v21, 1  ;;  %1016 = vperm.xlu0 %1602, %v992_v28  }
  0x55   : > { %v591_v26 = vadd.f32 %v590_v23, %v589_v20  ;;  %1021 = vperm.xlu1 %1603, %v993_v30  }
  0x56   : > { %v582_v27 = vadd.f32 %v581_v25, %v580_v21 }
  0x57   : > { %v593_v29 = vmul.f32 0.03125, %v591_v26 }
  0x58   : > { %v592_v31 = vmul.f32 0.03125, %v582_v27  ;;  %1139 = vperm.xlu0 %1602, %v1133_v34  }
  0x59   : > { %v595_v32 = vadd.f32 1e-05, %v593_v29  ;;  %1144 = vperm.xlu1 %1603, %v1134_v35  }
  0x5a   : > { %v594_v33 = vadd.f32 1e-05, %v592_v31 }
  0x5b   : > { %1619 = vrsqrt.f32 %v595_v32 }
  0x5c   : > { %1621 = vrsqrt.f32 %v594_v33  ;;  %1149 = vperm.xlu0 %1602, %v1135_v36  }
  0x5d   : > { %1154 = vperm.xlu1 %1603, %v1136_v37  }
  0x60   : > { %1245 = vperm.xlu0 %1602, %v1241_v38  }
  0x61   : > { %1250 = vperm.xlu1 %1603, %v1242_v39  }
  0x64   : > { %1316 = vperm.xlu0 %1602, %v1312_v46  }
  0x65   : > { %v1620_v40 = vpop.eup %1619 }
  0x66   : > { %v1622_v41 = vpop.eup %1621  ;;  %v599_v42 = vmul.f32 %v1620_v40, %v1986_v48  ;;  %v601_v43 = vmul.f32 %v1620_v40, %v1988_v49  ;;  %v603_v44 = vmul.f32 %v1620_v40, %v1990_v50  ;;  %v605_v45 = vmul.f32 %v1620_v40, %v1992_v51  ;;  %v1313_v48 = vld [vmem:[%s2224_s12 + $0x8] sm:$0xff] }
  0x67   : > { %v598_v47 = vmul.f32 %v1622_v41, %v1994_v52  ;;  %v600_v56 = vmul.f32 %v1622_v41, %v1996_v53  ;;  %v602_v57 = vmul.f32 %v1622_v41, %v1998_v54  ;;  %v604_v58 = vmul.f32 %v1622_v41, %v2000_v55  ;;  %1321 = vperm.xlu1 %1603, %v1313_v48   ;;  %v1604_v53 = vld [vmem:[%s2237_s1] sm:$0xff]   ;;  %v1605_v54 = vld [vmem:[%s2237_s1 + $0x8] sm:$0xff]   ;;  %v1606_v55 = vld [vmem:[%s2237_s1 + $0x10] sm:$0xff]   ;;  %s1747_s1 = sshll.u32 %s1808_s27, 4  ;;  %s1748_s1 = int_to_ptr.vmem [resolvable:$false] %s1747_s1 }
  0x68   : > { %v615_v49 = vpack.c.bf16 %v601_v43, %v599_v42  ;;  %v617_v50 = vpack.c.bf16 %v605_v45, %v603_v44  ;;  %1386 = vperm.xlu0 %1602, %v1383_v59   ;;  %s1749_s17 = scalar_lea.vmem %s1748_s1, 512  ;;  %p1750_p2 = scmp.lt.s32.totalorder %s2170_s22, %s1748_s1 }
  0x69   : > { %v614_v51 = vpack.c.bf16 %v600_v56, %v598_v47  ;;  %v616_v52 = vpack.c.bf16 %v604_v58, %v602_v57  ;;  %p1751_p3 = scmp.lt.s32.totalorder %s1749_s17, %s1743_s20 }
  0x6a   : > { %699 = vmatprep.subr.bf16.mxu0 %v615_v49 }
  0x6b   : > { %700 = vmatpush1.bf16.msra.mxu0 %v614_v51  ;;  %p1752_p4 = por %p1751_p3, %p1750_p2 }
  0x6c   : > { %701 = vmatprep.subr.bf16.mxu0 %v617_v50 }
  0x6d   : > { %p1753_p5 = pnand %p1752_p4, %p1746_p1 }
  0x6f   : > { %702 = vmatpush1.bf16.msra.mxu0 %v616_v52 }
  0x72   : > { %1528 = vmatmul.mubr.msk.bf16.vlgmr.msra.gmra.mrb[0].mxu0 %vm686_vm0, %v1604_v53 }
  0x73   : > { %741 = vmatprep.mubr.bf16.mxu0 %v1807_v8 }
  0x7a   : > { %1529 = vmatmul.mubr.msk.bf16.gmra.mrb[4].mxu0 %vm686_vm0, %v1605_v54 }
  0x7b   : > { %751 = vmatprep.mubr.bf16.mxu0 %v1807_v8 }
  0x82   : > { %1530 = vmatmul.mubr.msk.bf16.gmra.mrb[8].mxu0 %vm686_vm0, %v1606_v55 }
  0x83   : > { %761 = vmatprep.mubr.bf16.mxu0 %v1807_v8 }
  0x8a   : > { %1531 = vmatmul.mubr.msk.bf16.gmra.mrb[12].mxu0 %vm686_vm0, %v1607_v60 }
  0x8b   : > { %1080 = vmatprep.mubr.bf16.mxu0 %v1807_v8 }
  0xab   : > { %v629_v61 = vpop.permute.xlu0 %628  ;;  %v639_v6 = vpop.permute.xlu1 %638 }
  0xaf   : > { %v634_v1 = vpop.permute.xlu0 %633  ;;  %v644_v12 = vpop.permute.xlu1 %643 }
  0xb3   : > { %v649_v22 = vpop.permute.xlu0 %648  ;;  %v654_v28 = vpop.permute.xlu1 %653 }
  0xb7   : > { %v659_v38 = vpop.permute.xlu0 %658  ;;  %v664_v44 = vpop.permute.xlu1 %663 }
 0x145   : > { %v733_v62 = vpop.f32.mrb[0].mxu0 }
 0x146   : > { %v734_v63 = vadd.f32 %v733_v62, %v629_v61  ;;  %v735_v0 = vpop.f32.mrb[1].mxu0  ;;  %v1608_v62 = vld [vmem:[%s2215_s3] sm:$0xff]  }
 0x147   : > { %v736_v2 = vadd.f32 %v735_v0, %v629_v61  ;;  %v737_v3 = vpop.f32.mrb[2].mxu0  ;;  %v1610_v0 = vld [vmem:[%s2215_s3 + $0x10] sm:$0xff]  }
 0x148   : > { %1623 = vtanh.f32 %v734_v63  ;;  %v738_v4 = vadd.f32 %v737_v3, %v634_v1  ;;  %v739_v5 = vpop.f32.mrb[3].mxu0  ;;  %v1609_v63 = vld [vmem:[%s2215_s3 + $0x8] sm:$0xff]  }
 0x149   : > { %1625 = vtanh.f32 %v736_v2  ;;  %v740_v7 = vadd.f32 %v739_v5, %v634_v1  ;;  %v1611_v1 = vld [vmem:[%s2215_s3 + $0x18] sm:$0xff]   ;;  %v815_v2 = vpop.permute.xlu0 %814 }
 0x14a   : > { %1627 = vtanh.f32 %v738_v4 }
 0x14b   : > { %1629 = vtanh.f32 %v740_v7 }
 0x14d   : > { %v743_v9 = vpop.f32.mrb[4].mxu0 }
 0x14e   : > { %v744_v10 = vadd.f32 %v743_v9, %v639_v6  ;;  %v745_v11 = vpop.f32.mrb[5].mxu0 }
 0x14f   : > { %v746_v13 = vadd.f32 %v745_v11, %v639_v6  ;;  %v747_v14 = vpop.f32.mrb[6].mxu0  ;;  %v820_v6 = vpop.permute.xlu1 %819 }
 0x150   : > { %1631 = vtanh.f32 %v744_v10  ;;  %v748_v15 = vadd.f32 %v747_v14, %v644_v12  ;;  %v749_v16 = vpop.f32.mrb[7].mxu0 }
 0x151   : > { %1633 = vtanh.f32 %v746_v13  ;;  %v750_v17 = vadd.f32 %v749_v16, %v644_v12  ;;  %v825_v13 = vpop.permute.xlu0 %824 }
 0x152   : > { %v1624_v18 = vpop.eup %1623  ;;  %1635 = vtanh.f32 %v748_v15 }
 0x153   : > { %v1626_v19 = vpop.eup %1625  ;;  %1637 = vtanh.f32 %v750_v17  ;;  %v830_v17 = vpop.permute.xlu1 %829 }
 0x154   : > { %v1628_v20 = vpop.eup %1627 }
 0x155   : > { %v1630_v21 = vpop.eup %1629  ;;  %v753_v23 = vpop.f32.mrb[8].mxu0  ;;  %v796_v24 = vpack.c.bf16 %v1628_v20, %v1624_v18 }
 0x156   : > { %v754_v25 = vadd.f32 %v753_v23, %v649_v22  ;;  %v755_v26 = vpop.f32.mrb[9].mxu0  ;;  %v797_v27 = vpack.c.bf16 %v1630_v21, %v1626_v19 }
 0x157   : > { %v756_v29 = vadd.f32 %v755_v26, %v649_v22  ;;  %v757_v30 = vpop.f32.mrb[10].mxu0 }
 0x158   : > { %1639 = vtanh.f32 %v754_v25  ;;  %v758_v31 = vadd.f32 %v757_v30, %v654_v28  ;;  %v759_v32 = vpop.f32.mrb[11].mxu0  ;;  %885 = vmatprep.subr.bf16.mxu1 %v797_v27  ;;  %v835_v27 = vpop.permute.xlu0 %834 }
 0x159   : > { %1641 = vtanh.f32 %v756_v29  ;;  %v760_v33 = vadd.f32 %v759_v32, %v654_v28  ;;  %886 = vmatpush1.bf16.msra.mxu1 %v796_v24 }
 0x15a   : > { %v1632_v34 = vpop.eup %1631  ;;  %1643 = vtanh.f32 %v758_v31 }
 0x15b   : > { %v1634_v35 = vpop.eup %1633  ;;  %1645 = vtanh.f32 %v760_v33  ;;  %v840_v33 = vpop.permute.xlu1 %839 }
 0x15c   : > { %v1636_v36 = vpop.eup %1635 }
 0x15d   : > { %v1638_v37 = vpop.eup %1637  ;;  %v763_v39 = vpop.f32.mrb[12].mxu0  ;;  %v798_v40 = vpack.c.bf16 %v1636_v36, %v1632_v34 }
 0x15e   : > { %v764_v41 = vadd.f32 %v763_v39, %v659_v38  ;;  %v765_v42 = vpop.f32.mrb[13].mxu0  ;;  %v799_v43 = vpack.c.bf16 %v1638_v37, %v1634_v35 }
 0x15f   : > { %v766_v45 = vadd.f32 %v765_v42, %v659_v38  ;;  %v767_v46 = vpop.f32.mrb[14].mxu0 }
 0x160   : > { %1647 = vtanh.f32 %v764_v41  ;;  %v768_v47 = vadd.f32 %v767_v46, %v664_v44  ;;  %v769_v56 = vpop.f32.mrb[15].mxu0  ;;  %887 = vmatprep.subr.bf16.mxu1 %v799_v43  ;;  %v845_v43 = vpop.permute.xlu0 %844 }
 0x161   : > { %1649 = vtanh.f32 %v766_v45  ;;  %v770_v57 = vadd.f32 %v769_v56, %v664_v44  ;;  %888 = vmatpush1.bf16.msra.mxu1 %v798_v40 }
 0x162   : > { %v1640_v58 = vpop.eup %1639  ;;  %1651 = vtanh.f32 %v768_v47 }
 0x163   : > { %v1642_v48 = vpop.eup %1641  ;;  %1653 = vtanh.f32 %v770_v57  ;;  %v850_v57 = vpop.permute.xlu1 %849 }
 0x164   : > { %v1644_v49 = vpop.eup %1643 }
 0x165   : > { %v1646_v50 = vpop.eup %1645  ;;  %v800_v51 = vpack.c.bf16 %v1644_v49, %v1640_v58 }
 0x166   : > { %v801_v59 = vpack.c.bf16 %v1646_v50, %v1642_v48 }
 0x168   : > { %889 = vmatprep.subr.bf16.mxu1 %v801_v59 }
 0x169   : > { %890 = vmatpush1.bf16.msra.mxu1 %v800_v51 }
 0x16a   : > { %v1648_v52 = vpop.eup %1647 }
 0x16b   : > { %v1650_v53 = vpop.eup %1649 }
 0x16c   : > { %v1652_v54 = vpop.eup %1651 }
 0x16d   : > { %v1654_v55 = vpop.eup %1653  ;;  %v802_v60 = vpack.c.bf16 %v1652_v54, %v1648_v52 }
 0x16e   : > { %v803_v61 = vpack.c.bf16 %v1654_v55, %v1650_v53 }
 0x170   : > { %891 = vmatprep.subr.bf16.mxu1 %v803_v61 }
 0x171   : > { %892 = vmatpush1.bf16.msra.mxu1 %v802_v60 }
 0x174   : > { %1536 = vmatmul.mubr.msk.bf16.vlgmr.msra.gmra.mrb[0].mxu1 %vm872_vm1, %v1608_v62 }
 0x175   : > { %927 = vmatprep.mubr.bf16.mxu1 %v1807_v8 }
 0x17c   : > { %1537 = vmatmul.mubr.msk.bf16.gmra.mrb[4].mxu1 %vm872_vm1, %v1609_v63 }
 0x17d   : > { %937 = vmatprep.mubr.bf16.mxu1 %v1807_v8 }
 0x184   : > { %1538 = vmatmul.mubr.msk.bf16.gmra.mrb[8].mxu1 %vm872_vm1, %v1610_v0 }
 0x185   : > { %947 = vmatprep.mubr.bf16.mxu1 %v1807_v8 }
 0x18c   : > { %1539 = vmatmul.mubr.msk.bf16.gmra.mrb[12].mxu1 %vm872_vm1, %v1611_v1 }
 0x18d   : > { %1206 = vmatprep.mubr.bf16.mxu1 %v1807_v8 }
 0x247   : > { %v919_v3 = vpop.f32.mrb[0].mxu1 }
 0x248   : > { %v920_v4 = vadd.f32 %v919_v3, %v815_v2  ;;  %v921_v5 = vpop.f32.mrb[1].mxu1  ;;  %v1612_v3 = vld [vmem:[%s2217_s5] sm:$0xff]  }
 0x249   : > { %v922_v7 = vadd.f32 %v921_v5, %v815_v2  ;;  %v923_v9 = vpop.f32.mrb[2].mxu1  ;;  %v1614_v5 = vld [vmem:[%s2217_s5 + $0x10] sm:$0xff]  }
 0x24a   : > { %1655 = vtanh.f32 %v920_v4  ;;  %v924_v10 = vadd.f32 %v923_v9, %v820_v6  ;;  %v925_v11 = vpop.f32.mrb[3].mxu1  ;;  %v1613_v4 = vld [vmem:[%s2217_s5 + $0x8] sm:$0xff]  }
 0x24b   : > { %1657 = vtanh.f32 %v922_v7  ;;  %v926_v12 = vadd.f32 %v925_v11, %v820_v6  ;;  %v997_v6 = vpop.permute.xlu0 %996  ;;  %v1002_v11 = vpop.permute.xlu1 %1001 }
 0x24c   : > { %1659 = vtanh.f32 %v924_v10 }
 0x24d   : > { %1661 = vtanh.f32 %v926_v12 }
 0x24f   : > { %v929_v14 = vpop.f32.mrb[4].mxu1 }
 0x250   : > { %v930_v15 = vadd.f32 %v929_v14, %v825_v13  ;;  %v931_v16 = vpop.f32.mrb[5].mxu1 }
 0x251   : > { %v932_v18 = vadd.f32 %v931_v16, %v825_v13  ;;  %v933_v19 = vpop.f32.mrb[6].mxu1 }
 0x252   : > { %1663 = vtanh.f32 %v930_v15  ;;  %v934_v20 = vadd.f32 %v933_v19, %v830_v17  ;;  %v935_v21 = vpop.f32.mrb[7].mxu1 }
 0x253   : > { %1665 = vtanh.f32 %v932_v18  ;;  %v936_v22 = vadd.f32 %v935_v21, %v830_v17  ;;  %v1007_v17 = vpop.permute.xlu0 %1006  ;;  %v1012_v21 = vpop.permute.xlu1 %1011 }
 0x254   : > { %v1656_v23 = vpop.eup %1655  ;;  %1667 = vtanh.f32 %v934_v20 }
 0x255   : > { %v1658_v24 = vpop.eup %1657  ;;  %1669 = vtanh.f32 %v936_v22 }
 0x256   : > { %v1660_v25 = vpop.eup %1659 }
 0x257   : > { %v1662_v26 = vpop.eup %1661  ;;  %v939_v28 = vpop.f32.mrb[8].mxu1  ;;  %v980_v29 = vpack.c.bf16 %v1660_v25, %v1656_v23 }
 0x258   : > { %v940_v30 = vadd.f32 %v939_v28, %v835_v27  ;;  %v941_v31 = vpop.f32.mrb[9].mxu1  ;;  %v981_v32 = vpack.c.bf16 %v1662_v26, %v1658_v24 }
 0x259   : > { %v942_v34 = vadd.f32 %v941_v31, %v835_v27  ;;  %v943_v35 = vpop.f32.mrb[10].mxu1  ;;  %v1017_v31 = vpop.permute.xlu0 %1016 }
 0x25a   : > { %1671 = vtanh.f32 %v940_v30  ;;  %v944_v36 = vadd.f32 %v943_v35, %v840_v33  ;;  %v945_v37 = vpop.f32.mrb[11].mxu1  ;;  %1048 = vmatprep.subr.bf16.mxu0 %v981_v32 }
 0x25b   : > { %1673 = vtanh.f32 %v942_v34  ;;  %v946_v38 = vadd.f32 %v945_v37, %v840_v33  ;;  %1049 = vmatpush1.bf16.msra.mxu0 %v980_v29  ;;  %v1022_v37 = vpop.permute.xlu1 %1021 }
 0x25c   : > { %v1664_v39 = vpop.eup %1663  ;;  %1675 = vtanh.f32 %v944_v36 }
 0x25d   : > { %v1666_v40 = vpop.eup %1665  ;;  %1677 = vtanh.f32 %v946_v38 }
 0x25e   : > { %v1668_v41 = vpop.eup %1667 }
 0x25f   : > { %v1670_v42 = vpop.eup %1669  ;;  %v949_v44 = vpop.f32.mrb[12].mxu1  ;;  %v982_v45 = vpack.c.bf16 %v1668_v41, %v1664_v39 }
 0x260   : > { %v950_v46 = vadd.f32 %v949_v44, %v845_v43  ;;  %v951_v47 = vpop.f32.mrb[13].mxu1  ;;  %v983_v56 = vpack.c.bf16 %v1670_v42, %v1666_v40 }
 0x261   : > { %v952_v58 = vadd.f32 %v951_v47, %v845_v43  ;;  %v953_v48 = vpop.f32.mrb[14].mxu1 }
 0x262   : > { %1679 = vtanh.f32 %v950_v46  ;;  %v954_v49 = vadd.f32 %v953_v48, %v850_v57  ;;  %v955_v50 = vpop.f32.mrb[15].mxu1  ;;  %1050 = vmatprep.subr.bf16.mxu0 %v983_v56 }
 0x263   : > { %1681 = vtanh.f32 %v952_v58  ;;  %v956_v51 = vadd.f32 %v955_v50, %v850_v57  ;;  %1051 = vmatpush1.bf16.msra.mxu0 %v982_v45 }
 0x264   : > { %v1672_v59 = vpop.eup %1671  ;;  %1683 = vtanh.f32 %v954_v49 }
 0x265   : > { %v1674_v52 = vpop.eup %1673  ;;  %1685 = vtanh.f32 %v956_v51 }
 0x266   : > { %v1676_v53 = vpop.eup %1675 }
 0x267   : > { %v1678_v54 = vpop.eup %1677  ;;  %v984_v55 = vpack.c.bf16 %v1676_v53, %v1672_v59  ;;  %v1615_v59 = vld [vmem:[%s2219_s7] sm:$0xff]   ;;  %v1140_v53 = vpop.permute.xlu0 %1139 }
 0x268   : > { %v985_v60 = vpack.c.bf16 %v1678_v54, %v1674_v52  ;;  %v1616_v52 = vld [vmem:[%s2219_s7 + $0x8] sm:$0xff]  }
 0x26a   : > { %1052 = vmatprep.subr.bf16.mxu0 %v985_v60 }
 0x26b   : > { %1053 = vmatpush1.bf16.msra.mxu0 %v984_v55 }
 0x26c   : > { %v1680_v61 = vpop.eup %1679 }
 0x26d   : > { %v1682_v62 = vpop.eup %1681 }
 0x26e   : > { %v1684_v63 = vpop.eup %1683 }
 0x26f   : > { %v1686_v0 = vpop.eup %1685  ;;  %v986_v1 = vpack.c.bf16 %v1684_v63, %v1680_v61  ;;  %v1145_v61 = vpop.permute.xlu1 %1144 }
 0x270   : > { %v987_v2 = vpack.c.bf16 %v1686_v0, %v1682_v62 }
 0x272   : > { %1054 = vmatprep.subr.bf16.mxu0 %v987_v2 }
 0x273   : > { %1055 = vmatpush1.bf16.msra.mxu0 %v986_v1 }
 0x276   : > { %1543 = vmatmul.mubr.msk.bf16.vlgmr.msra.gmra.mrb[16].mxu0 %vm872_vm1, %v1612_v3  ;;  %v1150_v3 = vpop.permute.xlu0 %1149 }
 0x277   : > { %1090 = vmatprep.mubr.bf16.mxu0 %v1807_v8 }
 0x27e   : > { %1544 = vmatmul.mubr.msk.bf16.gmra.mrb[20].mxu0 %vm872_vm1, %v1613_v4 }
 0x27f   : > { %1100 = vmatprep.mubr.bf16.mxu0 %v1807_v8 }
 0x286   : > { %1545 = vmatmul.mubr.msk.bf16.gmra.mrb[24].mxu0 %vm872_vm1, %v1614_v5 }
 0x287   : > { %1293 = vmatprep.mubr.bf16.mxu0 %v1807_v8 }
 0x349   : > { %v1082_v7 = vpop.f32.mrb[16].mxu0 }
 0x34a   : > { %v1083_v9 = vadd.f32 %v1082_v7, %v997_v6  ;;  %v1084_v10 = vpop.f32.mrb[17].mxu0  ;;  %v1155_v7 = vpop.permute.xlu1 %1154 }
 0x34b   : > { %v1085_v12 = vadd.f32 %v1084_v10, %v997_v6  ;;  %v1086_v13 = vpop.f32.mrb[18].mxu0 }
 0x34c   : > { %1687 = vtanh.f32 %v1083_v9  ;;  %v1087_v14 = vadd.f32 %v1086_v13, %v1002_v11  ;;  %v1088_v15 = vpop.f32.mrb[19].mxu0 }
 0x34d   : > { %1689 = vtanh.f32 %v1085_v12  ;;  %v1089_v16 = vadd.f32 %v1088_v15, %v1002_v11 }
 0x34e   : > { %1691 = vtanh.f32 %v1087_v14 }
 0x34f   : > { %1693 = vtanh.f32 %v1089_v16 }
 0x351   : > { %v1092_v18 = vpop.f32.mrb[20].mxu0 }
 0x352   : > { %v1093_v19 = vadd.f32 %v1092_v18, %v1007_v17  ;;  %v1094_v20 = vpop.f32.mrb[21].mxu0 }
 0x353   : > { %v1095_v22 = vadd.f32 %v1094_v20, %v1007_v17  ;;  %v1096_v23 = vpop.f32.mrb[22].mxu0 }
 0x354   : > { %1695 = vtanh.f32 %v1093_v19  ;;  %v1097_v24 = vadd.f32 %v1096_v23, %v1012_v21  ;;  %v1098_v25 = vpop.f32.mrb[23].mxu0 }
 0x355   : > { %1697 = vtanh.f32 %v1095_v22  ;;  %v1099_v26 = vadd.f32 %v1098_v25, %v1012_v21 }
 0x356   : > { %v1688_v27 = vpop.eup %1687  ;;  %1699 = vtanh.f32 %v1097_v24 }
 0x357   : > { %v1690_v28 = vpop.eup %1689  ;;  %1701 = vtanh.f32 %v1099_v26  ;;  %v1617_v26 = vld [vmem:[%s2221_s9] sm:$0xff]  }
 0x358   : > { %v1692_v29 = vpop.eup %1691 }
 0x359   : > { %v1694_v30 = vpop.eup %1693  ;;  %v1102_v32 = vpop.f32.mrb[24].mxu0  ;;  %v1127_v33 = vpack.c.bf16 %v1692_v29, %v1688_v27 }
 0x35a   : > { %v1103_v34 = vadd.f32 %v1102_v32, %v1017_v31  ;;  %v1104_v35 = vpop.f32.mrb[25].mxu0  ;;  %v1128_v36 = vpack.c.bf16 %v1694_v30, %v1690_v28  ;;  %v1246_v27 = vpop.permute.xlu0 %1245 }
 0x35b   : > { %v1105_v38 = vadd.f32 %v1104_v35, %v1017_v31  ;;  %v1106_v39 = vpop.f32.mrb[26].mxu0  ;;  %v1251_v31 = vpop.permute.xlu1 %1250 }
 0x35c   : > { %1703 = vtanh.f32 %v1103_v34  ;;  %v1107_v40 = vadd.f32 %v1106_v39, %v1022_v37  ;;  %v1108_v41 = vpop.f32.mrb[27].mxu0  ;;  %1174 = vmatprep.subr.bf16.mxu1 %v1128_v36 }
 0x35d   : > { %1705 = vtanh.f32 %v1105_v38  ;;  %v1109_v42 = vadd.f32 %v1108_v41, %v1022_v37  ;;  %1175 = vmatpush1.bf16.msra.mxu1 %v1127_v33 }
 0x35e   : > { %v1696_v43 = vpop.eup %1695  ;;  %1707 = vtanh.f32 %v1107_v40 }
 0x35f   : > { %v1698_v44 = vpop.eup %1697  ;;  %1709 = vtanh.f32 %v1109_v42  ;;  %v1618_v42 = vld [vmem:[%s2223_s11] sm:$0xff]  }
 0x360   : > { %v1700_v45 = vpop.eup %1699 }
 0x361   : > { %v1702_v46 = vpop.eup %1701  ;;  %v1129_v47 = vpack.c.bf16 %v1700_v45, %v1696_v43  ;;  %v1317_v43 = vpop.permute.xlu0 %1316 }
 0x362   : > { %v1130_v56 = vpack.c.bf16 %v1702_v46, %v1698_v44 }
 0x364   : > { %1176 = vmatprep.subr.bf16.mxu1 %v1130_v56 }
 0x365   : > { %1177 = vmatpush1.bf16.msra.mxu1 %v1129_v47  ;;  %v1322_v47 = vpop.permute.xlu1 %1321 }
 0x366   : > { %v1704_v57 = vpop.eup %1703 }
 0x367   : > { %v1706_v58 = vpop.eup %1705 }
 0x368   : > { %v1708_v48 = vpop.eup %1707 }
 0x369   : > { %v1710_v49 = vpop.eup %1709  ;;  %v1131_v50 = vpack.c.bf16 %v1708_v48, %v1704_v57 }
 0x36a   : > { %v1132_v51 = vpack.c.bf16 %v1710_v49, %v1706_v58 }
 0x36c   : > { %1178 = vmatprep.subr.bf16.mxu1 %v1132_v51 }
 0x36d   : > { %1179 = vmatpush1.bf16.msra.mxu1 %v1131_v50 }
 0x370   : > { %1548 = vmatmul.mubr.msk.bf16.vlgmr.msra.gmra.mrb[16].mxu1 %vm1167_vm2, %v1615_v59 }
 0x371   : > { %1216 = vmatprep.mubr.bf16.mxu1 %v1807_v8 }
 0x378   : > { %1549 = vmatmul.mubr.msk.bf16.gmra.mrb[20].mxu1 %vm1167_vm2, %v1616_v52 }
 0x379   : > { %1365 = vmatprep.mubr.bf16.mxu1 %v1807_v8 }
 0x443   : > { %v1208_v54 = vpop.f32.mrb[16].mxu1 }
 0x444   : > { %v1209_v55 = vadd.f32 %v1208_v54, %v1140_v53  ;;  %v1210_v60 = vpop.f32.mrb[17].mxu1 }
 0x445   : > { %v1211_v62 = vadd.f32 %v1210_v60, %v1140_v53  ;;  %v1212_v63 = vpop.f32.mrb[18].mxu1  ;;  %v1387_v60 = vpop.permute.xlu0 %1386 }
 0x446   : > { %1711 = vtanh.f32 %v1209_v55  ;;  %v1213_v0 = vadd.f32 %v1212_v63, %v1145_v61  ;;  %v1214_v1 = vpop.f32.mrb[19].mxu1  ;;  %v1380_v55 = vld [vmem:[%s2225_s13] sm:$0xf] }
 0x447   : > { %1713 = vtanh.f32 %v1211_v62  ;;  %v1215_v2 = vadd.f32 %v1214_v1, %v1145_v61 }
 0x448   : > { %1715 = vtanh.f32 %v1213_v0 }
 0x449   : > { %1717 = vtanh.f32 %v1215_v2 }
 0x44b   : > { %v1218_v4 = vpop.f32.mrb[20].mxu1 }
 0x44c   : > { %v1219_v5 = vadd.f32 %v1218_v4, %v1150_v3  ;;  %v1220_v6 = vpop.f32.mrb[21].mxu1 }
 0x44d   : > { %v1221_v9 = vadd.f32 %v1220_v6, %v1150_v3  ;;  %v1222_v10 = vpop.f32.mrb[22].mxu1 }
 0x44e   : > { %1719 = vtanh.f32 %v1219_v5  ;;  %v1223_v11 = vadd.f32 %v1222_v10, %v1155_v7  ;;  %v1224_v12 = vpop.f32.mrb[23].mxu1 }
 0x44f   : > { %1721 = vtanh.f32 %v1221_v9  ;;  %v1225_v13 = vadd.f32 %v1224_v12, %v1155_v7 }
 0x450   : > { %v1712_v14 = vpop.eup %1711  ;;  %1723 = vtanh.f32 %v1223_v11 }
 0x451   : > { %v1714_v15 = vpop.eup %1713  ;;  %1725 = vtanh.f32 %v1225_v13 }
 0x452   : > { %v1716_v16 = vpop.eup %1715 }
 0x453   : > { %v1718_v17 = vpop.eup %1717  ;;  %v1237_v18 = vpack.c.bf16 %v1716_v16, %v1712_v14 }
 0x454   : > { %v1238_v19 = vpack.c.bf16 %v1718_v17, %v1714_v15 }
 0x456   : > { %1261 = vmatprep.subr.bf16.mxu0 %v1238_v19 }
 0x457   : > { %1262 = vmatpush1.bf16.msra.mxu0 %v1237_v18 }
 0x458   : > { %v1720_v20 = vpop.eup %1719 }
 0x459   : > { %v1722_v21 = vpop.eup %1721 }
 0x45a   : > { %v1724_v22 = vpop.eup %1723 }
 0x45b   : > { %v1726_v23 = vpop.eup %1725  ;;  %v1239_v24 = vpack.c.bf16 %v1724_v22, %v1720_v20 }
 0x45c   : > { %v1240_v25 = vpack.c.bf16 %v1726_v23, %v1722_v21 }
 0x45e   : > { %1263 = vmatprep.subr.bf16.mxu0 %v1240_v25 }
 0x45f   : > { %1264 = vmatpush1.bf16.msra.mxu0 %v1239_v24 }
 0x462   : > { %1551 = vmatmul.mubr.msk.bf16.vlgmr.msra.gmra.mrb[28].mxu0 %vm686_vm0, %v1617_v26 }
 0x463   : > { %1424 = vmatprep.mubr.bf16.mxu0 %v1807_v8 }
 0x535   : > { %v1295_v28 = vpop.f32.mrb[28].mxu0 }
 0x536   : > { %v1296_v29 = vadd.f32 %v1295_v28, %v1246_v27  ;;  %v1297_v30 = vpop.f32.mrb[29].mxu0 }
 0x537   : > { %v1298_v32 = vadd.f32 %v1297_v30, %v1246_v27  ;;  %v1299_v33 = vpop.f32.mrb[30].mxu0 }
 0x538   : > { %1727 = vtanh.f32 %v1296_v29  ;;  %v1300_v34 = vadd.f32 %v1299_v33, %v1251_v31  ;;  %v1301_v35 = vpop.f32.mrb[31].mxu0 }
 0x539   : > { %1729 = vtanh.f32 %v1298_v32  ;;  %v1302_v36 = vadd.f32 %v1301_v35, %v1251_v31 }
 0x53a   : > { %1731 = vtanh.f32 %v1300_v34 }
 0x53b   : > { %1733 = vtanh.f32 %v1302_v36 }
 0x542   : > { %v1728_v37 = vpop.eup %1727 }
 0x543   : > { %v1730_v38 = vpop.eup %1729 }
 0x544   : > { %v1732_v39 = vpop.eup %1731 }
 0x545   : > { %v1734_v40 = vpop.eup %1733  ;;  %v1310_v41 = vpack.c.bf16 %v1732_v39, %v1728_v37 }
 0x546   : > { %v1311_v8 = vpack.c.bf16 %v1734_v40, %v1730_v38 }
 0x548   : > { %1333 = vmatprep.subr.bf16.mxu1 %v1311_v8 }
 0x549   : > { %1334 = vmatpush1.bf16.msra.mxu1 %v1310_v41 }
 0x54c   : > { %1553 = vmatmul.mubr.msk.bf16.vlgmr.msra.gmra.mrb[24].mxu1 %vm1329_vm3, %v1618_v42 }
 0x61f   : > { %v1367_v44 = vpop.f32.mrb[24].mxu1 }
 0x620   : > { %v1368_v45 = vadd.f32 %v1367_v44, %v1317_v43  ;;  %v1369_v46 = vpop.f32.mrb[25].mxu1 }
 0x621   : > { %v1370_v56 = vadd.f32 %v1369_v46, %v1317_v43  ;;  %v1371_v57 = vpop.f32.mrb[26].mxu1 }
 0x622   : > { %1735 = vtanh.f32 %v1368_v45  ;;  %v1372_v58 = vadd.f32 %v1371_v57, %v1322_v47  ;;  %v1373_v48 = vpop.f32.mrb[27].mxu1 }
 0x623   : > { %1737 = vtanh.f32 %v1370_v56  ;;  %v1374_v49 = vadd.f32 %v1373_v48, %v1322_v47 }
 0x624   : > { %1739 = vtanh.f32 %v1372_v58 }
 0x625   : > { %1741 = vtanh.f32 %v1374_v49 }
 0x62c   : > { %v1736_v50 = vpop.eup %1735 }
 0x62d   : > { %v1738_v51 = vpop.eup %1737 }
 0x62e   : > { %v1740_v59 = vpop.eup %1739 }
 0x62f   : > { %v1742_v52 = vpop.eup %1741  ;;  %v1381_v53 = vpack.c.bf16 %v1740_v59, %v1736_v50 }
 0x630   : > { %v1382_v54 = vpack.c.bf16 %v1742_v52, %v1738_v51 }
 0x632   : > { %1392 = vmatprep.subr.bf16.mxu0 %v1382_v54 }
 0x633   : > { %1393 = vmatpush1.bf16.msra.mxu0 %v1381_v53 }
 0x636   : > { %1554 = vmatmul.mubr.msk.bf16.vlgmr.msra.gmra.mrb[32].mxu0 %vm1329_vm3, %v1380_v55 }
 0x709   : > { %v1426_v61 = vpop.f32.mrb[32].mxu0 }
 0x70a   : > { %v1427_v62 = vadd.f32 %v1426_v61, %v1387_v60  ;;  %v1428_v63 = vpop.f32.mrb[33].mxu0 }
 0x70b   : > { %v1429_v0 = vadd.f32 %v1428_v63, %v1387_v60  ;;  %v1430_v1 = vpop.f32.mrb[34].mxu0 }
 0x70c   : > { %1433 = vst [vmem:[%s526_s16] sm:$0xff] %v1427_v62  ;;  %v1431_v2 = vpop.f32.mrb[35].mxu0 }
 0x70d   : > { %1434 = vst [vmem:[%s526_s16 + $0x8] sm:$0xff] %v1429_v0 }
 0x70e   : > { %1756 = shalt.err (!%p1753_p5)
}
 0x70f   : > { %s1757_s30 = scalar_lea.hbm %s2168_s26, 256  ;;  %s1761_s25 = scalar_lea.hbm %s2227_s15, 512 }
 0x710   : > { %p1758_p7 = scmp.ne.s32.totalorder %s2168_s26, %s1757_s30  ;;  %p1762_p12 = scmp.lt.u32.totalorder %s2168_s26, %s2227_s15 }
 0x711   : > { %p1763_p13 = scmp.lt.u32.totalorder %s1761_s25, %s1757_s30  ;;  %p1765_p1 = scmp.lt.u32.totalorder %s1757_s30, %s2168_s26 }
 0x712   : > { %p1759_p10 = pnand %p1758_p7, %p1927_p6 }
 0x713   : > { %p1764_p0 = por %p1763_p13, %p1762_p12 }
 0x714   : > { %p1760_p11 = pneg %p1759_p10 }
 0x715   : > { %p1766_p2 = por %p1765_p1, %p1764_p0 }
 0x717   : > { %p1767_p3 = pnand %p1766_p2, %p1760_p11 }
 0x719   : > { %1770 = shalt.err (!%p1767_p3)
}
 0x71a   : > { %1562 = dma.vmem_to_hbm [thread:$0]  (%p1927_p6), %s2170_s22, 256, %s2168_s26, %s1436_s0  }
 0x71b PF: > { %s1462_s20 = sand.u32 1, %s1793_s18   ;;  %p1565_p4 = pnand %p1517_p9, %p1931_p8 }
 0x71c   : > { %s1463_s17 = scalar_lea.sflag [#allocation4], %s1462_s20 }
 0x71d   : > { %1788 = dma.done.wait (!%p1565_p4), %s1463_s17, 256  }
 0x71e   : > { %1790 = vsyncadd (!%p1565_p4), %s1463_s17, 4294967040  ;;  %s2239_s30 = sld [smem:[#allocation6_spill]]  ;;  %s2240_s20 = sld [smem:[#allocation7_spill]] }
 0x71f   : > { %p25_p5 = scmp.ge.s32.totalorder %s1912_s24, 4   ;;  %s2241_s18 = smov %s1797_s19 }
 0x720   : > { %s2243_s21 = smov %s1912_s24 }
 0x721   :  { %27 = sbr.rel (!%p25_p5) target bundleno = 6 (0x6), region = 143 }
 0x724   : > { %s2242_s19 = smov %s2239_s30 }
 0x728   :  { %1468 = vsyncpa [#allocation4], 1 }
 0x729   :  { %1470 = vsyncpa [#allocation4 + $0x1], 1 }

</bundles_post_ra>
